<compile_context>
chip_gen: v7x
topology: tpu7x:2x2x1
jax: 0.10.0
libtpu: 0.0.40
codegen_flags: <defaults>
</compile_context>

<pallas_src>
import functools

import jax
import jax.numpy as jnp
from jax import lax
from jax.experimental import pallas as pl
from jax.experimental.pallas import tpu as pltpu


def _round_up(x, m):
    return ((x + m - 1) // m) * m


def _cdiv(a, b):
    return (a + b - 1) // b


def _gen_defaults():
    """Generation-aware (vmem_limit_bytes, knn_tile_n)."""
    vmem_cap = 128 * 1024 * 1024
    try:
        info = pltpu.get_tpu_info()
        vmem_cap = int(getattr(info, "vmem_capacity_bytes", vmem_cap))
    except Exception:
        pass
    if vmem_cap <= 64 * 1024 * 1024:
        # v7x-class: 64 MiB per TensorCore -> leave headroom, shrink kNN tile
        return 48 * 1024 * 1024, 128
    # v5e / v6e: 128 MiB physical, 16/32 MiB default scoped limit
    return 64 * 1024 * 1024, 256


# --------- Pallas kernel 1: fused pairwise distance + dilated kNN -----------
def _knn_kernel(k, d, q_ref, kt_ref, xx_ref, idx_ref):
    # q_ref: (1, tile_n, C) bf16 queries, kt_ref: (1, C, N) bf16 keys (transposed),
    # xx_ref: (1, 1, N) f32 per-key squared norms (precomputed in XLA).
    q = q_ref[0]                                               # (tn, C) bf16
    kt = kt_ref[0]                                             # (C, N)  bf16
    xx = xx_ref[0]                                             # (1, N)  f32

    # bf16 x bf16 -> f32 accumulate: MXU fast path on v5e/v6e/v7x
    inner = jnp.dot(q, kt, preferred_element_type=jnp.float32)  # (tn, N)
    qf = q.astype(jnp.float32)
    qq = jnp.sum(qf * qf, axis=-1, keepdims=True)               # (tn, 1)
    dist = jnp.maximum(qq - 2.0 * inner + xx, 0.0)              # (tn, N) >= 0

    tn, n = dist.shape
    lane = lax.broadcasted_iota(jnp.int32, (tn, n), 1)
    nbits = max(1, (n - 1).bit_length())
    idx_mask = jnp.int32((1 << nbits) - 1)
    hi_mask = jnp.int32(~((1 << nbits) - 1))
    # Pack (distance, lane) into one int32 key: non-negative f32 bit patterns
    # order like int32, low bits carry the lane index (breaks ties by index).
    packed = (pltpu.bitcast(dist, jnp.int32) & hi_mask) | lane
    sentinel = jnp.int32(2 ** 31 - 1)

    col = lax.broadcasted_iota(jnp.int32, (tn, k), 1)
    out = jnp.zeros((tn, k), jnp.int32)
    # dilated top-(k*d): one XLU min per extracted neighbour; keep ranks 0, d, 2d,...
    for j in range(k * d):
        mn = jnp.min(packed, axis=-1, keepdims=True)            # (tn, 1)
        if j % d == 0:
            out = jnp.where(col == (j // d), mn & idx_mask, out)
        packed = jnp.where(packed == mn, sentinel, packed)
    idx_ref[0] = out


def dilated_knn(q_pts, keys_t, xx, k, d, *, max_tile_n=None):
    """q_pts: (B, N, C) bf16, keys_t: (B, C, N) bf16, xx: (B, 1, N) f32
    -> neighbour indices (B, N, k) int32."""
    B, N, C = q_pts.shape
    vmem_limit, gen_tile_n = _gen_defaults()
    if max_tile_n is None:
        max_tile_n = gen_tile_n
    tile_n = min(max_tile_n, _round_up(N, 8))
    n_pad = _round_up(N, tile_n)
    q = q_pts if n_pad == N else jnp.pad(q_pts, ((0, 0), (0, n_pad - N), (0, 0)))
    idx = pl.pallas_call(
        functools.partial(_knn_kernel, k, d),
        out_shape=jax.ShapeDtypeStruct((B, n_pad, k), jnp.int32),
        grid=(B, n_pad // tile_n),
        in_specs=[
            pl.BlockSpec((1, tile_n, C), lambda b, i: (b, i, 0)),   # query tile
            pl.BlockSpec((1, C, N), lambda b, i: (b, 0, 0)),        # all keys (T)
            pl.BlockSpec((1, 1, N), lambda b, i: (b, 0, 0)),        # key norms
        ],
        out_specs=pl.BlockSpec((1, tile_n, k), lambda b, i: (b, i, 0)),
        compiler_params=pltpu.CompilerParams(
            dimension_semantics=("parallel", "parallel"),
            vmem_limit_bytes=vmem_limit),
    )(q, keys_t, xx)
    return idx[:, :N, :]


# ------- Pallas kernel 2: attention aggregation + folded conv/BN/LReLU -------
def _edge_agg_kernel(k, C, D, center_ref, diff_ref, w1a_ref, w1bd_ref, b1_ref,
                     wca_ref, wcb_ref, bc_ref, out_ref):
    center = center_ref[...]                      # (tm, C)  bf16
    diff = diff_ref[...]                          # (tm, kC) bf16

    # attention logits: att_j = [center, diff_j] @ W1^T + b1
    #                         = center @ W1a + diff_j @ W1b + b1
    # -> center part once; all k diff parts in ONE wide block-diagonal matmul.
    att_c = jnp.dot(center, w1a_ref[...], preferred_element_type=jnp.float32)   # (tm, D)
    att_d = jnp.dot(diff, w1bd_ref[...], preferred_element_type=jnp.float32)    # (tm, kD)
    base = att_c + b1_ref[...]

    atts = [base + att_d[:, j * D:(j + 1) * D] for j in range(k)]
    mx = atts[0]
    for a in atts[1:]:
        mx = jnp.maximum(mx, a)
    es = [jnp.exp(a - mx) for a in atts]
    den = es[0]
    for e in es[1:]:
        den = den + e
    inv = pl.reciprocal(den, approx=True)         # (tm, D), EUP slot (~free)

    # f_agg = sum_j softmax_j * [center, diff_j]
    w_center = es[0][:, :C]
    for e in es[1:]:
        w_center = w_center + e[:, :C]
    agg_a = center.astype(jnp.float32) * w_center * inv[:, :C]           # (tm, C)
    agg_b = diff[:, 0:C].astype(jnp.float32) * es[0][:, C:]
    for j in range(1, k):
        agg_b = agg_b + diff[:, j * C:(j + 1) * C].astype(jnp.float32) * es[j][:, C:]
    agg_b = agg_b * inv[:, C:]                                           # (tm, C)

    # folded 1x1 conv + BN (bf16 MXU operands, f32 acc), transposed -> lane-dense
    cdims = (((1,), (1,)), ((), ()))
    y = (lax.dot_general(wca_ref[...], agg_a.astype(jnp.bfloat16), cdims,
                         preferred_element_type=jnp.float32)
         + lax.dot_general(wcb_ref[...], agg_b.astype(jnp.bfloat16), cdims,
                           preferred_element_type=jnp.float32)
         + bc_ref[...])
    out_ref[...] = jnp.where(y > 0.0, y, 0.2 * y).astype(out_ref.dtype)  # LeakyReLU(0.2)


def edge_aggregate(center, diff, w1a, w1bd, b1, wc_a, wc_b, bc, *, k, max_tile_m=2048):
    """center: (M, C) bf16, diff: (M, k*C) bf16 -> (out_c, M) bf16 (transposed)."""
    M, C = center.shape
    kC = diff.shape[1]
    D = 2 * C
    out_c = wc_a.shape[0]
    vmem_limit, _ = _gen_defaults()

    # cap the row tile so double-buffered bf16 inputs + live f32 temporaries fit
    bytes_per_row = 4 * (kC + C + out_c) + 4 * (3 * k * D + 4 * D)
    rows = max(128, (vmem_limit // 3) // max(bytes_per_row, 1))
    tile_m = min(max_tile_m, _round_up(M, 128), (rows // 128) * 128)
    m_pad = _round_up(M, tile_m)
    # megacore (v7x has 2 TCs): prefer >= 2 row blocks when there is enough work
    if m_pad // tile_m < 2 and m_pad > 128:
        tile_m = _round_up(_cdiv(m_pad, 2), 128)
        m_pad = _round_up(M, tile_m)
    if m_pad != M:
        # zero rows are harmless (uniform softmax of zeros, agg = 0) and sliced off
        center = jnp.pad(center, ((0, m_pad - M), (0, 0)))
        diff = jnp.pad(diff, ((0, m_pad - M), (0, 0)))

    out = pl.pallas_call(
        functools.partial(_edge_agg_kernel, k, C, D),
        out_shape=jax.ShapeDtypeStruct((out_c, m_pad), jnp.bfloat16),
        grid=(m_pad // tile_m,),
        in_specs=[
            pl.BlockSpec((tile_m, C), lambda i: (i, 0)),
            pl.BlockSpec((tile_m, kC), lambda i: (i, 0)),
            pl.BlockSpec((C, D), lambda i: (0, 0)),            # grid-invariant weights
            pl.BlockSpec((kC, k * D), lambda i: (0, 0)),
            pl.BlockSpec((1, D), lambda i: (0, 0)),
            pl.BlockSpec((out_c, C), lambda i: (0, 0)),
            pl.BlockSpec((out_c, C), lambda i: (0, 0)),
            pl.BlockSpec((out_c, 1), lambda i: (0, 0)),
        ],
        out_specs=pl.BlockSpec((out_c, tile_m), lambda i: (0, i)),
        compiler_params=pltpu.CompilerParams(
            dimension_semantics=("parallel",),
            vmem_limit_bytes=vmem_limit),
    )(center, diff, w1a, w1bd, b1, wc_a, wc_b, bc)
    return out[:, :M]


# ----------------------------- parameter setup -------------------------------
def init_edge_feature_params(key, in_channel, out_channel):
    ks = jax.random.split(key, 8)
    lim = 1.0 / jnp.sqrt(jnp.float32(in_channel))
    return dict(
        # nn.Linear(in_channel, in_channel): weight (out,in), bias (out,)
        w1=jax.random.uniform(ks[0], (in_channel, in_channel), jnp.float32, -lim, lim),
        b1=jax.random.uniform(ks[1], (in_channel,), jnp.float32, -lim, lim),
        # nn.Conv2d(in_channel, out_channel, 1): weight (out,in), bias (out,)
        wc=jax.random.uniform(ks[2], (out_channel, in_channel), jnp.float32, -lim, lim),
        bc=jax.random.uniform(ks[3], (out_channel,), jnp.float32, -lim, lim),
        # BatchNorm2d(out_channel), inference-mode (running stats)
        gamma=1.0 + 0.1 * jax.random.normal(ks[4], (out_channel,), jnp.float32),
        beta=0.1 * jax.random.normal(ks[5], (out_channel,), jnp.float32),
        mean=0.1 * jax.random.normal(ks[6], (out_channel,), jnp.float32),
        var=1.0 + 0.1 * jnp.abs(jax.random.normal(ks[7], (out_channel,), jnp.float32)),
    )


# ------------------------------ module forward -------------------------------
def get_edge_feature(params, points, k, d):
    """Equivalent of GetEdgeFeature.forward: (B, N, C) -> (B, N, out_channel) bf16."""
    B, N, C = points.shape
    assert k * d <= N, "need k*d <= num_points"

    pts_bf = points.astype(jnp.bfloat16)
    # keys pre-transposed (canonical MXU matmul) + key squared norms (tiny, XLA)
    pts_t = jnp.transpose(pts_bf, (0, 2, 1))                        # (B, C, N)
    xx = jnp.sum(jnp.square(pts_bf.astype(jnp.float32)), axis=-1)[:, None, :]  # (B,1,N)
    idx = dilated_knn(pts_bf, pts_t, xx, k, d)                      # (B, N, k)

    # TODO(synk): fuse this data-dependent neighbour gather into the aggregation
    # kernel (scalar-prefetch idx + in-kernel DMA gather) to remove the
    # (B, N, k, C) HBM round-trip entirely.
    edge = jax.vmap(lambda p, i: p[i])(pts_bf, idx)                 # (B, N, k, C)
    diff = pts_bf[:, :, None, :] - edge                             # center - edge
    M = B * N
    center2d = pts_bf.reshape(M, C)                                 # (M, C)
    diff2d = diff.reshape(M, k * C)                                 # (M, k*C)

    D = 2 * C
    # fold BN (inference) into the 1x1 conv
    eps = 1e-5
    scale = params["gamma"] / jnp.sqrt(params["var"] + eps)
    wc_fold = params["wc"] * scale[:, None]                         # (out_c, D)
    bc_fold = (params["bc"] - params["mean"]) * scale + params["beta"]
    out_c = wc_fold.shape[0]

    # split W1 (torch (out,in) layout) into center / diff halves, diff half as a
    # block-diagonal (kC, kD) matrix so all k attention matmuls are one wide dot
    w1 = params["w1"]                                               # (D, D)
    w1a = jnp.transpose(w1[:, :C]).astype(jnp.bfloat16)             # (C, D)
    w1b = jnp.transpose(w1[:, C:])                                  # (C, D) f32
    w1bd = jnp.kron(jnp.eye(k, dtype=w1b.dtype), w1b).astype(jnp.bfloat16)  # (kC, kD)

    out_t = edge_aggregate(
        center2d, diff2d, w1a, w1bd,
        params["b1"][None, :].astype(jnp.float32),                  # (1, D)
        wc_fold[:, :C].astype(jnp.bfloat16),                        # (out_c, C)
        wc_fold[:, C:].astype(jnp.bfloat16),                        # (out_c, C)
        bc_fold[:, None].astype(jnp.float32),                       # (out_c, 1)
        k=k,
    )                                                               # (out_c, M) bf16
    return out_t.T.reshape(B, N, out_c)


def pointnet_set_abstraction(params_list, mlp1, new_points, k, d):
    cur_points = None
    for i in range(len(mlp1)):
        if i == 0:
            new_points = get_edge_feature(params_list[0], new_points, k, d)
            cur_points = new_points
        elif i == 1:
            new_points = get_edge_feature(params_list[1], new_points, k, d)
            cur_points = jnp.concatenate([cur_points, new_points], axis=-1)
            new_points = cur_points
        else:
            new_points = get_edge_feature(params_list[2], new_points, k, d)
            cur_points = cur_points + new_points
    return cur_points.astype(jnp.float32)


if __name__ == "__main__":
    key = jax.random.PRNGKey(0)
    B, N, C0 = 2, 16, 4              # points: (batch, num_points, feature_dim)
    mlp1 = [8, 8, 16]                # requires mlp1[0]==mlp1[1], mlp1[2]==mlp1[0]+mlp1[1]
    in_channel = 2 * C0              # feature_set dim of the first edge-conv
    k_nn, dilation = 4, 2

    kp, k0, k1, k2 = jax.random.split(key, 4)
    new_points = jax.random.normal(kp, (B, N, C0), jnp.float32)

    in_channels = [in_channel, 2 * mlp1[0], 4 * mlp1[1]]
    params_list = [
        init_edge_feature_params(kk, ic, oc)
        for kk, ic, oc in zip([k0, k1, k2], in_channels, mlp1)
    ]

    out = pointnet_set_abstraction(params_list, mlp1, new_points, k_nn, dilation)
    out = jax.block_until_ready(out)
    assert out.shape == (B, N, mlp1[0] + mlp1[1]), out.shape
    assert out.dtype == jnp.float32
    print("KERNEL_OK")
</pallas_src>

<mosaic_0001>
module attributes {stable_mosaic.version = 11 : i64} {
  func.func @_knn_kernel(%arg0: i32, %arg1: i32, %arg2: memref<1x16x4xbf16, #tpu.memory_space<vmem>>, %arg3: memref<1x4x16xbf16, #tpu.memory_space<vmem>>, %arg4: memref<1x1x16xf32, #tpu.memory_space<vmem>>, %arg5: memref<1x16x4xi32, #tpu.memory_space<vmem>>) attributes {dimension_semantics = [#tpu.dimension_semantics<parallel>, #tpu.dimension_semantics<parallel>], iteration_bounds = array<i64: 2, 1>, scalar_prefetch = 0 : i64, scratch_operands = 0 : i64, tpu.core_type = #tpu.core_type<tc>, window_params = [{transform_indices = @transform_0, window_bounds = array<i64: 1, 16, 4>}, {transform_indices = @transform_1, window_bounds = array<i64: 1, 4, 16>}, {transform_indices = @transform_2, window_bounds = array<i64: 1, 1, 16>}, {transform_indices = @transform_3, window_bounds = array<i64: 1, 16, 4>}]} {
    %c0 = arith.constant 0 : index
    %c0_0 = arith.constant 0 : index
    %c0_1 = arith.constant 0 : index
    %0 = vector.load %arg2[%c0, %c0_0, %c0_1] : memref<1x16x4xbf16, #tpu.memory_space<vmem>>, vector<1x16x4xbf16>
    %1 = vector.shape_cast %0 : vector<1x16x4xbf16> to vector<16x4xbf16>
    %c0_2 = arith.constant 0 : index
    %c0_3 = arith.constant 0 : index
    %c0_4 = arith.constant 0 : index
    %2 = vector.load %arg3[%c0_2, %c0_3, %c0_4] : memref<1x4x16xbf16, #tpu.memory_space<vmem>>, vector<1x4x16xbf16>
    %3 = vector.shape_cast %2 : vector<1x4x16xbf16> to vector<4x16xbf16>
    %c0_5 = arith.constant 0 : index
    %c0_6 = arith.constant 0 : index
    %c0_7 = arith.constant 0 : index
    %4 = vector.load %arg4[%c0_5, %c0_6, %c0_7] : memref<1x1x16xf32, #tpu.memory_space<vmem>>, vector<1x1x16xf32>
    %5 = vector.shape_cast %4 : vector<1x1x16xf32> to vector<1x16xf32>
    %cst = arith.constant dense<0.000000e+00> : vector<16x16xf32>
    %6 = tpu.matmul %1, %3, %cst {dimension_numbers = #tpu.dot_dimension_numbers<[1], [0], [0], [1], [0, 0, 1, 1], [], []>} : vector<16x4xbf16>, vector<4x16xbf16>, vector<16x16xf32> -> vector<16x16xf32>
    %7 = arith.extf %1 : vector<16x4xbf16> to vector<16x4xf32>
    %8 = arith.mulf %7, %7 : vector<16x4xf32>
    %cst_8 = arith.constant dense<0.000000e+00> : vector<16xf32>
    %9 = vector.multi_reduction <add>, %8, %cst_8 [1] : vector<16x4xf32> to vector<16xf32>
    %10 = vector.shape_cast %9 : vector<16xf32> to vector<16x1xf32>
    %cst_9 = arith.constant 2.000000e+00 : f32
    %11 = vector.broadcast %cst_9 : f32 to vector<16x16xf32>
    %12 = arith.mulf %11, %6 : vector<16x16xf32>
    %13 = vector.broadcast %10 : vector<16x1xf32> to vector<16x16xf32>
    %14 = arith.subf %13, %12 : vector<16x16xf32>
    %15 = vector.broadcast %5 : vector<1x16xf32> to vector<16x16xf32>
    %16 = arith.addf %14, %15 : vector<16x16xf32>
    %cst_10 = arith.constant 0.000000e+00 : f32
    %17 = vector.broadcast %cst_10 : f32 to vector<16x16xf32>
    %18 = arith.maximumf %16, %17 : vector<16x16xf32>
    %19 = tpu.iota {dimensions = array<i32: 1>} : vector<16x16xi32>
    %20 = tpu.bitcast %18 : vector<16x16xf32> -> vector<16x16xi32>
    %c-16_i32 = arith.constant -16 : i32
    %21 = vector.broadcast %c-16_i32 : i32 to vector<16x16xi32>
    %22 = arith.andi %20, %21 : vector<16x16xi32>
    %23 = arith.ori %22, %19 : vector<16x16xi32>
    %24 = tpu.iota {dimensions = array<i32: 1>} : vector<16x4xi32>
    %c0_i32 = arith.constant 0 : i32
    %25 = vector.broadcast %c0_i32 : i32 to vector<16x4xi32>
    %cst_11 = arith.constant dense<2147483647> : vector<16xi32>
    %26 = vector.multi_reduction <minsi>, %23, %cst_11 [1] : vector<16x16xi32> to vector<16xi32>
    %27 = vector.shape_cast %26 : vector<16xi32> to vector<16x1xi32>
    %c0_i32_12 = arith.constant 0 : i32
    %28 = vector.broadcast %c0_i32_12 : i32 to vector<16x4xi32>
    %29 = arith.cmpi eq, %24, %28 : vector<16x4xi32>
    %c15_i32 = arith.constant 15 : i32
    %30 = vector.broadcast %c15_i32 : i32 to vector<16x1xi32>
    %31 = arith.andi %27, %30 : vector<16x1xi32>
    %32 = vector.shape_cast %31 : vector<16x1xi32> to vector<16x1xi32>
    %33 = vector.broadcast %32 : vector<16x1xi32> to vector<16x4xi32>
    %34 = arith.select %29, %33, %25 : vector<16x4xi1>, vector<16x4xi32>
    %35 = vector.broadcast %27 : vector<16x1xi32> to vector<16x16xi32>
    %36 = arith.cmpi eq, %23, %35 : vector<16x16xi32>
    %c2147483647_i32 = arith.constant 2147483647 : i32
    %37 = vector.broadcast %c2147483647_i32 : i32 to vector<16x16xi32>
    %38 = arith.select %36, %37, %23 : vector<16x16xi1>, vector<16x16xi32>
    %cst_13 = arith.constant dense<2147483647> : vector<16xi32>
    %39 = vector.multi_reduction <minsi>, %38, %cst_13 [1] : vector<16x16xi32> to vector<16xi32>
    %40 = vector.shape_cast %39 : vector<16xi32> to vector<16x1xi32>
    %41 = vector.broadcast %40 : vector<16x1xi32> to vector<16x16xi32>
    %42 = arith.cmpi eq, %38, %41 : vector<16x16xi32>
    %c2147483647_i32_14 = arith.constant 2147483647 : i32
    %43 = vector.broadcast %c2147483647_i32_14 : i32 to vector<16x16xi32>
    %44 = arith.select %42, %43, %38 : vector<16x16xi1>, vector<16x16xi32>
    %cst_15 = arith.constant dense<2147483647> : vector<16xi32>
    %45 = vector.multi_reduction <minsi>, %44, %cst_15 [1] : vector<16x16xi32> to vector<16xi32>
    %46 = vector.shape_cast %45 : vector<16xi32> to vector<16x1xi32>
    %c1_i32 = arith.constant 1 : i32
    %47 = vector.broadcast %c1_i32 : i32 to vector<16x4xi32>
    %48 = arith.cmpi eq, %24, %47 : vector<16x4xi32>
    %c15_i32_16 = arith.constant 15 : i32
    %49 = vector.broadcast %c15_i32_16 : i32 to vector<16x1xi32>
    %50 = arith.andi %46, %49 : vector<16x1xi32>
    %51 = vector.shape_cast %50 : vector<16x1xi32> to vector<16x1xi32>
    %52 = vector.broadcast %51 : vector<16x1xi32> to vector<16x4xi32>
    %53 = arith.select %48, %52, %34 : vector<16x4xi1>, vector<16x4xi32>
    %54 = vector.broadcast %46 : vector<16x1xi32> to vector<16x16xi32>
    %55 = arith.cmpi eq, %44, %54 : vector<16x16xi32>
    %c2147483647_i32_17 = arith.constant 2147483647 : i32
    %56 = vector.broadcast %c2147483647_i32_17 : i32 to vector<16x16xi32>
    %57 = arith.select %55, %56, %44 : vector<16x16xi1>, vector<16x16xi32>
    %cst_18 = arith.constant dense<2147483647> : vector<16xi32>
    %58 = vector.multi_reduction <minsi>, %57, %cst_18 [1] : vector<16x16xi32> to vector<16xi32>
    %59 = vector.shape_cast %58 : vector<16xi32> to vector<16x1xi32>
    %60 = vector.broadcast %59 : vector<16x1xi32> to vector<16x16xi32>
    %61 = arith.cmpi eq, %57, %60 : vector<16x16xi32>
    %c2147483647_i32_19 = arith.constant 2147483647 : i32
    %62 = vector.broadcast %c2147483647_i32_19 : i32 to vector<16x16xi32>
    %63 = arith.select %61, %62, %57 : vector<16x16xi1>, vector<16x16xi32>
    %cst_20 = arith.constant dense<2147483647> : vector<16xi32>
    %64 = vector.multi_reduction <minsi>, %63, %cst_20 [1] : vector<16x16xi32> to vector<16xi32>
    %65 = vector.shape_cast %64 : vector<16xi32> to vector<16x1xi32>
    %c2_i32 = arith.constant 2 : i32
    %66 = vector.broadcast %c2_i32 : i32 to vector<16x4xi32>
    %67 = arith.cmpi eq, %24, %66 : vector<16x4xi32>
    %c15_i32_21 = arith.constant 15 : i32
    %68 = vector.broadcast %c15_i32_21 : i32 to vector<16x1xi32>
    %69 = arith.andi %65, %68 : vector<16x1xi32>
    %70 = vector.shape_cast %69 : vector<16x1xi32> to vector<16x1xi32>
    %71 = vector.broadcast %70 : vector<16x1xi32> to vector<16x4xi32>
    %72 = arith.select %67, %71, %53 : vector<16x4xi1>, vector<16x4xi32>
    %73 = vector.broadcast %65 : vector<16x1xi32> to vector<16x16xi32>
    %74 = arith.cmpi eq, %63, %73 : vector<16x16xi32>
    %c2147483647_i32_22 = arith.constant 2147483647 : i32
    %75 = vector.broadcast %c2147483647_i32_22 : i32 to vector<16x16xi32>
    %76 = arith.select %74, %75, %63 : vector<16x16xi1>, vector<16x16xi32>
    %cst_23 = arith.constant dense<2147483647> : vector<16xi32>
    %77 = vector.multi_reduction <minsi>, %76, %cst_23 [1] : vector<16x16xi32> to vector<16xi32>
    %78 = vector.shape_cast %77 : vector<16xi32> to vector<16x1xi32>
    %79 = vector.broadcast %78 : vector<16x1xi32> to vector<16x16xi32>
    %80 = arith.cmpi eq, %76, %79 : vector<16x16xi32>
    %c2147483647_i32_24 = arith.constant 2147483647 : i32
    %81 = vector.broadcast %c2147483647_i32_24 : i32 to vector<16x16xi32>
    %82 = arith.select %80, %81, %76 : vector<16x16xi1>, vector<16x16xi32>
    %cst_25 = arith.constant dense<2147483647> : vector<16xi32>
    %83 = vector.multi_reduction <minsi>, %82, %cst_25 [1] : vector<16x16xi32> to vector<16xi32>
    %84 = vector.shape_cast %83 : vector<16xi32> to vector<16x1xi32>
    %c3_i32 = arith.constant 3 : i32
    %85 = vector.broadcast %c3_i32 : i32 to vector<16x4xi32>
    %86 = arith.cmpi eq, %24, %85 : vector<16x4xi32>
    %c15_i32_26 = arith.constant 15 : i32
    %87 = vector.broadcast %c15_i32_26 : i32 to vector<16x1xi32>
    %88 = arith.andi %84, %87 : vector<16x1xi32>
    %89 = vector.shape_cast %88 : vector<16x1xi32> to vector<16x1xi32>
    %90 = vector.broadcast %89 : vector<16x1xi32> to vector<16x4xi32>
    %91 = arith.select %86, %90, %72 : vector<16x4xi1>, vector<16x4xi32>
    %c0_27 = arith.constant 0 : index
    %c0_28 = arith.constant 0 : index
    %c0_29 = arith.constant 0 : index
    %92 = vector.load %arg5[%c0_27, %c0_28, %c0_29] : memref<1x16x4xi32, #tpu.memory_space<vmem>>, vector<1x16x4xi32>
    %93 = vector.shape_cast %92 : vector<1x16x4xi32> to vector<16x4xi32>
    %94 = vector.shape_cast %91 : vector<16x4xi32> to vector<1x16x4xi32>
    tpu.vector_store %arg5[%c0_27, %c0_28, %c0_29], %94 {strides = array<i32>} : memref<1x16x4xi32, #tpu.memory_space<vmem>>, vector<1x16x4xi32>,
    return
  }
  func.func @transform_0(%arg0: i32, %arg1: i32) -> (i32, i32, i32) {
    %c0_i32 = arith.constant 0 : i32
    %c0_i32_0 = arith.constant 0 : i32
    return %arg0, %arg1, %c0_i32 : i32, i32, i32
  }
  func.func @transform_1(%arg0: i32, %arg1: i32) -> (i32, i32, i32) {
    %c0_i32 = arith.constant 0 : i32
    %c0_i32_0 = arith.constant 0 : i32
    %c0_i32_1 = arith.constant 0 : i32
    return %arg0, %c0_i32, %c0_i32_0 : i32, i32, i32
  }
  func.func @transform_2(%arg0: i32, %arg1: i32) -> (i32, i32, i32) {
    %c0_i32 = arith.constant 0 : i32
    %c0_i32_0 = arith.constant 0 : i32
    %c0_i32_1 = arith.constant 0 : i32
    return %arg0, %c0_i32, %c0_i32_0 : i32, i32, i32
  }
  func.func @transform_3(%arg0: i32, %arg1: i32) -> (i32, i32, i32) {
    %c0_i32 = arith.constant 0 : i32
    %c0_i32_0 = arith.constant 0 : i32
    return %arg0, %arg1, %c0_i32 : i32, i32, i32
  }
}

</mosaic_0001>

<bundles_post_ra>
// kernel: tpu_custom_call.1
= control target key start
LH: loop header
LB: loop body
LE: loop exit
PB: predicated region body
PF: predicated region fallthrough
CT: control target
= control target key end

     0   :  { %s1402_s0 = inlined_call_operand.hbm [shape: bf16[2,16,4], index: 0, kind: input, shape index: {}]   ;;  %s1403_s1 = inlined_call_operand.hbm [shape: bf16[2,4,16], index: 1, kind: input, shape index: {}]   ;;  %s1404_s2 = inlined_call_operand.hbm [shape: f32[2,1,16], index: 2, kind: input, shape index: {}]   ;;  %s1405_s3 = inlined_call_operand.hbm [shape: s32[2,16,4], index: 3, kind: output, shape index: {}]  }
   0x1   :  { %1410 = sst [smem:[#allocation13_spill]] %s1402_s0 }
   0x2   :  { %1411 = sst [smem:[#allocation14_spill]] %s1403_s1 }
   0x3   :  { %8 = vsyncpa [#allocation3], 0 }
   0x4   :  { %10 = vsyncpa [#allocation3 + $0x1], 0 }
   0x5   :  { %11 = vsyncpa [#allocation6], 0 }
   0x6   :  { %13 = vsyncpa [#allocation6 + $0x1], 0 }
   0x7   :  { %14 = vsyncpa [#allocation4], 0 }
   0x8   :  { %16 = vsyncpa [#allocation4 + $0x1], 0  ;;  %s1088_s12 = smov 0   ;;  %s1090_s13 = smov 0  }
   0x9   :  { %s1092_s14 = smov 0   ;;  %s1094_s15 = smov 0  }
   0xa   :  { %s1096_s16 = smov 0   ;;  %s1098_s17 = smov 0  }
   0xb LB: > { %s1119_s18 = sadd.s32 4294967295, %s1056_s17   ;;  %s769_s19 = sadd.s32 4294967294, %s1056_s17   ;;  %s1056_s17 = sphi %s1098_s17, %s22_s17   ;;  %s1052_s16 = sphi %s1096_s16, %s1435_s16   ;;  %s1048_s15 = sphi %s1094_s15, %s1434_s15   ;;  %s1044_s14 = sphi %s1092_s14, %s1433_s14   ;;  %s1040_s13 = sphi %s1090_s13, %s1432_s13   ;;  %s1036_s12 = sphi %s1088_s12, %s1431_s12  }
   0xc   : > { %s34_s20 = sadd.s32 1, %s1052_s16  ;;  %s43_s21 = sadd.s32 1, %s1044_s14 }
   0xd   : > { %p36_p0 = scmp.ge.s32.totalorder %s34_s20, 2  ;;  %p50_p1 = scmp.ne.s32.totalorder %s1044_s14, %s1040_s13 }
   0xe   : > { %p51_p2 = scmp.eq.s32.totalorder %s1056_s17, 0  ;;  %p56_p3 = scmp.ne.s32.totalorder %s1040_s13, %s1036_s12 }
   0xf   : > { %s1437_s20 = smov (%p36_p0, %s34_s20), 0  ;;  %p57_p5 = scmp.eq.s32.totalorder %s1119_s18, 0 }
  0x10   : > { %1412 = sst [smem:[#allocation12_spill]] %s1437_s20  ;;  %p1131_p4 = por %p51_p2, %p50_p1 }
  0x11   : > { %s38_s23 = ssub.s32 %s1052_s16, %s1437_s20  ;;  %p134_p6 = scmp.eq.s32.totalorder %s1119_s18, 1 }
  0x12   : > { %p41_p7 = scmp.eq.s32.totalorder %s38_s23, 0  ;;  %p1139_p8 = por %p57_p5, %p56_p3 }
  0x13   : > { %p1143_p9 = por %p134_p6, %p50_p1  ;;  %p140_p10 = scmp.eq.s32.totalorder %s769_s19, 1 }
  0x14   : > { %s1414_s24 = scalar_select %p1139_p8, 1, 0 }
  0x15   : > { %s1415_s25 = scalar_select %p1143_p9, 1, 0 }
  0x16   : > { %s1148_s26 = scalar_select %p41_p7, %s1044_s14, %s43_s21  }
  0x17   : > { %p1150_p11 = por %p140_p10, %p56_p3  ;;  %p822_p13 = scmp.lt.s32.totalorder %s1056_s17, 2 }
  0x18   : > { %s1157_s28 = sand.u32 1, %s1044_s14   ;;  %s183_s29 = sand.u32 1, %s1056_s17  }
  0x19   : > { %s1416_s27 = scalar_select %p1150_p11, 1, 0 }
  0x1a   : > { %s775_s30 = sshll.u32 %s1157_s28, 1  ;;  %p1163_p0 = pnand %p822_p13, %p1131_p4 }
  0x1b   : > { %s776_s5 = sshll.u32 %s1052_s16, 5  ;;  %s1418_s1 = sld [smem:[#allocation14_spill]] }
  0x1c   : > { %s1417_s4 = scalar_select %p1163_p0, 1, 0 }
  0x1d   : > { %s187_s9 = scalar_lea.vmem [#allocation5], %s775_s30  ;;  %s1177_s11 = scalar_lea.sflag [#allocation6], %s183_s29 }
  0x1e   : > { %s194_s10 = sshll.u32 %s187_s9, 4  ;;  %p1183_p4 = pneg %p1163_p0  ;;  %s1174_s10 = int_to_ptr.vmem [resolvable:$true] %s194_s10 }
  0x21   : > { %s1171_s8 = scalar_lea.hbm %s1418_s1, %s776_s5  ;;  %s885_s30 = scalar_lea.hbm %s1418_s1, 64 }
  0x22   : > { %s880_s19 = scalar_lea.hbm %s1171_s8, 32  ;;  %p886_p7 = scmp.lt.u32.totalorder %s1171_s8, %s1418_s1 }
  0x23   : > { %p881_p3 = scmp.ne.s32.totalorder %s1171_s8, %s880_s19  ;;  %p887_p10 = scmp.lt.u32.totalorder %s885_s30, %s880_s19 }
  0x24   : > { %p889_p12 = scmp.lt.u32.totalorder %s880_s19, %s1171_s8 }
  0x25   : > { %p883_p5 = pnand %p1183_p4, %p881_p3  ;;  %p888_p13 = por %p887_p10, %p886_p7 }
  0x27   : > { %p884_p6 = pneg %p883_p5  ;;  %p890_p1 = por %p889_p12, %p888_p13 }
  0x29   : > { %p891_p2 = pnand %p890_p1, %p884_p6 }
  0x2b   : > { %894 = shalt.err (!%p891_p2)
}
  0x2c   : > { %s895_s29 = scalar_lea.vmem %s1174_s10, 32  ;;  %s1058_s7 = smov [#allocation5]  }
  0x2d   : > { %p896_p3 = scmp.ne.s32.totalorder %s1174_s10, %s895_s29  ;;  %s900_s9 = sshll.u32 %s1058_s7, 4  ;;  %s901_s9 = int_to_ptr.vmem [resolvable:$false] %s900_s9 }
  0x2e   : > { %s902_s22 = scalar_lea.vmem %s901_s9, 64  ;;  %p903_p9 = scmp.lt.s32.totalorder %s1174_s10, %s901_s9 }
  0x2f   : > { %p898_p5 = pnand %p896_p3, %p1183_p4  ;;  %p904_p8 = scmp.lt.s32.totalorder %s902_s22, %s895_s29 }
  0x31   : > { %p899_p11 = pneg %p898_p5  ;;  %p905_p7 = por %p904_p8, %p903_p9 }
  0x33   : > { %p906_p10 = pnand %p905_p7, %p899_p11 }
  0x35   : > { %909 = shalt.err (!%p906_p10)
}
  0x36   : > { %814 = dma.hbm_to_vmem [thread:$0]  (!%p1163_p0), %s1171_s8, 32, %s1174_s10, %s1177_s11  }
  0x37   : > { %p1420_p12 = scmp.lt.s32.totalorder %s1056_s17, 3  ;;  %p1421_p1 = scmp.ge.s32.totalorder %s1056_s17, 1 }
  0x38   : > { %s772_s23 = sshll.u32 %s1157_s28, 3  ;;  %s790_s30 = sshll.u32 %s1052_s16, 7 }
  0x39   : > { %p1211_p2 = pnand %p1421_p1, %p1420_p12  ;;  %s1423_s0 = sld [smem:[#allocation13_spill]] }
  0x3a   : > { %s164_s7 = scalar_lea.vmem [#allocation2], %s772_s23  ;;  %s161_s8 = scalar_lea.sflag [#allocation3], %s1157_s28 }
  0x3b   : > { %s1422_s19 = scalar_select %p1211_p2, 1, 0 }
  0x3c   : > { %s173_s9 = sshll.u32 %s164_s7, 4  ;;  %s1222_s9 = int_to_ptr.vmem [resolvable:$true] %s173_s9 }
  0x3f   : > { %s1220_s29 = scalar_lea.hbm %s1423_s0, %s790_s30  ;;  %s915_s5 = scalar_lea.hbm %s1423_s0, 256 }
  0x40   : > { %s910_s10 = scalar_lea.hbm %s1220_s29, 128  ;;  %p916_p6 = scmp.lt.u32.totalorder %s1220_s29, %s1423_s0 }
  0x41   : > { %p911_p8 = scmp.ne.s32.totalorder %s1220_s29, %s910_s10  ;;  %p917_p13 = scmp.lt.u32.totalorder %s915_s5, %s910_s10 }
  0x42   : > { %p919_p5 = scmp.lt.u32.totalorder %s910_s10, %s1220_s29 }
  0x43   : > { %p913_p9 = pnand %p911_p8, %p1183_p4  ;;  %p918_p3 = por %p917_p13, %p916_p6 }
  0x45   : > { %p914_p11 = pneg %p913_p9  ;;  %p920_p7 = por %p919_p5, %p918_p3 }
  0x47   : > { %p921_p10 = pnand %p920_p7, %p914_p11 }
  0x49   : > { %924 = shalt.err (!%p921_p10)
}
  0x4a   : > { %s925_s23 = scalar_lea.vmem %s1222_s9, 128  ;;  %s1059_s1 = smov [#allocation2]  }
  0x4b   : > { %p926_p12 = scmp.ne.s32.totalorder %s1222_s9, %s925_s23  ;;  %s930_s7 = sshll.u32 %s1059_s1, 4  ;;  %s931_s7 = int_to_ptr.vmem [resolvable:$false] %s930_s7 }
  0x4c   : > { %s932_s22 = scalar_lea.vmem %s931_s7, 256  ;;  %p933_p9 = scmp.lt.s32.totalorder %s1222_s9, %s931_s7 }
  0x4d   : > { %p928_p1 = pnand %p926_p12, %p1183_p4  ;;  %p934_p2 = scmp.lt.s32.totalorder %s932_s22, %s925_s23 }
  0x4f   : > { %p929_p8 = pneg %p928_p1  ;;  %p935_p6 = por %p934_p2, %p933_p9 }
  0x51   : > { %p936_p13 = pnand %p935_p6, %p929_p8 }
  0x53   : > { %939 = shalt.err (!%p936_p13)
}
  0x54   : > { %s1060_s10 = smov 64   ;;  %s1061_s5 = smov 4  }
  0x55   : > { %811 = dma.hbm_to_vmem [thread:$0]  (!%p1163_p0), %s1220_s29, 128, %s1222_s9, %s161_s8, %s1060_s10, %s1060_s10, %s1061_s5  }
  0x56   : > { %s777_s30 = sshll.u32 %s1052_s16, 4  ;;  %s204_s7 = scalar_lea.vmem [#allocation7], %s1157_s28 }
  0x57   : > { %s1252_s23 = scalar_lea.hbm %s1404_s2, %s777_s30  ;;  %s211_s22 = sshll.u32 %s204_s7, 4  ;;  %s212_s22 = int_to_ptr.vmem [resolvable:$true] %s211_s22 }
  0x58   : > { %s940_s0 = scalar_lea.hbm %s1252_s23, 16  ;;  %s945_s9 = scalar_lea.hbm %s1404_s2, 32 }
  0x59   : > { %p941_p2 = scmp.ne.s32.totalorder %s1252_s23, %s940_s0  ;;  %p946_p5 = scmp.lt.u32.totalorder %s1252_s23, %s1404_s2 }
  0x5a   : > { %p947_p7 = scmp.lt.u32.totalorder %s945_s9, %s940_s0  ;;  %p949_p12 = scmp.lt.u32.totalorder %s940_s0, %s1252_s23 }
  0x5b   : > { %p943_p11 = pnand %p941_p2, %p1183_p4 }
  0x5c   : > { %p948_p10 = por %p947_p7, %p946_p5 }
  0x5d   : > { %p944_p3 = pneg %p943_p11 }
  0x5e   : > { %p950_p1 = por %p949_p12, %p948_p10 }
  0x60   : > { %p951_p8 = pnand %p950_p1, %p944_p3 }
  0x62   : > { %954 = shalt.err (!%p951_p8)
}
  0x63   : > { %s955_s28 = scalar_lea.vmem %s212_s22, 16  ;;  %s1062_s5 = smov [#allocation7]  }
  0x64   : > { %p956_p9 = scmp.ne.s32.totalorder %s212_s22, %s955_s28  ;;  %s960_s30 = sshll.u32 %s1062_s5, 4  ;;  %s961_s30 = int_to_ptr.vmem [resolvable:$false] %s960_s30 }
  0x65   : > { %s962_s20 = scalar_lea.vmem %s961_s30, 32  ;;  %p963_p2 = scmp.lt.s32.totalorder %s212_s22, %s961_s30 }
  0x66   : > { %p958_p6 = pnand %p956_p9, %p1183_p4  ;;  %p964_p11 = scmp.lt.s32.totalorder %s962_s20, %s955_s28 }
  0x68   : > { %p959_p13 = pneg %p958_p6  ;;  %p965_p0 = por %p964_p11, %p963_p2 }
  0x6a   : > { %p966_p5 = pnand %p965_p0, %p959_p13 }
  0x6c   : > { %969 = shalt.err (!%p966_p5)
}
  0x6d   : > { %p1424_p7 = scmp.ne.s32.totalorder %s1417_s4, 0  ;;  %p1425_p3 = scmp.ne.s32.totalorder %s1422_s19, 0 }
  0x6e   : > { %s1276_s0 = sand.u32 (!%p1425_p3), 1, %s1040_s13   ;;  %p1426_p4 = scmp.ne.s32.totalorder (!%p1425_p3), %s1414_s24, 0 }
  0x6f   : > { %817 = dma.hbm_to_vmem [thread:$0]  (!%p1424_p7), %s1252_s23, 16, %s212_s22, %s1177_s11  }
  0x70   : > { %220 = sbr.rel (%p1425_p3) target bundleno = 2451 (0x993), region = 32  ;;  %s779_s21 = sshll.u32 (!%p1425_p3), %s1276_s0, 3 }
  0x71   : > { %s223_s6 = scalar_lea.sflag (!%p1425_p3), [#allocation3], %s1276_s0  ;;  %s226_s1 = scalar_lea.vmem (!%p1425_p3), [#allocation2], %s779_s21 }
  0x77   : > { %1023 = dma.done.wait (%p1426_p4), %s223_s6, 128  }
  0x78   : > { %1025 = vsyncadd (%p1426_p4), %s223_s6, 4294967168  ;;  %s231_s4 = sand.u32 1, %s1119_s18   ;;  %s780_s11 = sshll.u32 %s1276_s0, 1 }
  0x79   : > { %s232_s19 = scalar_lea.sflag [#allocation6], %s231_s4  ;;  %s235_s23 = scalar_lea.vmem [#allocation5], %s780_s11 }
  0x7a   : > { %1027 = dma.done.wait (%p1426_p4), %s232_s19, 48  }
  0x7b   : > { %1029 = vsyncadd (%p1426_p4), %s232_s19, 4294967248  ;;  %v1063_v0 = vmov 0.0   ;;  %vm1064_vm0 = vmmov 0   ;;  %vm291_vm1 = vcmask 1041408   ;;  %v280_v1 = vld [vmem:[%s235_s23] sm:$0x3]  ;;  %v360_v20 = vlaneseq }
  0x7c   : > { %794 = vmatprep.subr.bf16.mxu0 %v1063_v0  ;;  %796 = vmatprep.mubr.msk.bf16.mxu0 %vm1064_vm0, %v1063_v0  ;;  %v278_v2 = vld [vmem:[%s226_s1] sm:$0xff]   ;;  %v293_v3 = vsel %vm291_vm1, %v280_v1, 0  ;;  %vm287_vm2 = vcmask 31744   ;;  %s243_s18 = scalar_lea.vmem [#allocation7], %s1276_s0  ;;  %vm368_vm3 = vcmask 130048   ;;  %s781_s24 = sshll.u32 %s1276_s0, 4 }
  0x7d   : > { %v336_v4 = vunpack.c.l.bf16 %v278_v2  ;;  %v337_v5 = vunpack.c.h.bf16 %v278_v2  ;;  %795 = vmatpush3.bf16.msra.mxu0 %v293_v3  ;;  %v784_v15 = vld [vmem:[%s243_s18] ss:$0 sm:$0xff]  ;;  %v1294_v23 = vand.u32 127, %v360_v20  ;;  %s791_s7 = sshll.u32 %s1048_s15, 8  ;;  %s274_s22 = scalar_lea.vmem [#allocation8], %s781_s24 }
  0x7e   : > { %s641_s29 = sshll.u32 %s274_s22, 4  ;;  %s1349_s10 = scalar_lea.hbm %s1405_s3, %s791_s7  ;;  %s1351_s29 = int_to_ptr.vmem [resolvable:$true] %s641_s29 }
  0x7f   : > { %v338_v6 = vmul.f32 %v336_v4, %v336_v4  ;;  %v339_v7 = vmul.f32 %v337_v5, %v337_v5  ;;  %vm399_vm14 = vcmp.eq.s32.totalorder %v1294_v23, 0  ;;  %vm472_vm15 = vcmp.eq.s32.totalorder %v1294_v23, 1  ;;  %s626_s15 = scalar_lea.sflag [#allocation4], %s1276_s0  ;;  %s970_s28 = scalar_lea.vmem %s1351_s29, 256 }
  0x80   : > { %797 = vmatmul.mubr.msk.bf16.vlgmr.msra.gmra.mrb[0].mxu0 %vm287_vm2, %v278_v2  ;;  %p971_p0 = scmp.ne.s32.totalorder %s1351_s29, %s970_s28  ;;  %p1427_p10 = scmp.ne.s32.totalorder %s1415_s25, 0 }
  0x81   : > { %v340_v8 = vsel %vm287_vm2, %v338_v6, 0.0  ;;  %v343_v9 = vsel %vm287_vm2, %v339_v7, 0.0  ;;  %s1065_s5 = smov [#allocation8]  }
  0x82   : > { %341 = vadd.xlane.f32.xlu0 %v340_v8  ;;  %p972_p12 = pnand %p971_p0, %p1427_p10  ;;  %s974_s30 = sshll.u32 %s1065_s5, 4  ;;  %s975_s30 = int_to_ptr.vmem [resolvable:$false] %s974_s30 }
  0x83   : > { %s976_s20 = scalar_lea.vmem %s975_s30, 512  ;;  %p977_p8 = scmp.lt.s32.totalorder %s1351_s29, %s975_s30 }
  0x84   : > { %p973_p1 = pneg %p972_p12  ;;  %p978_p9 = scmp.lt.s32.totalorder %s976_s20, %s970_s28 }
  0x86   : > { %344 = vadd.xlane.f32.xlu0 %v343_v9  ;;  %p979_p6 = por %p978_p9, %p977_p8 }
  0x88   : > { %p980_p13 = pnand %p979_p6, %p973_p1 }
 0x10f   : > { %v342_v10 = vpop.xlane.xlu0 %341 }
 0x113   : > { %v345_v16 = vpop.xlane.xlu0 %344 }
 0x153   : > { %v329_v11 = vpop.f32.mrb[0].mxu0 }
 0x154   : > { %v346_v12 = vmul.f32 2.0, %v329_v11  ;;  %v798_v13 = vpop.f32.mrb[1].mxu0 }
 0x155   : > { %v332_v14 = vpop.f32.mrb[2].mxu0 }
 0x156   : > { %v348_v17 = vsub.f32 %v342_v10, %v346_v12  ;;  %v347_v18 = vmul.f32 2.0, %v332_v14  ;;  %v799_v19 = vpop.f32.mrb[3].mxu0 }
 0x158   : > { %v349_v21 = vsub.f32 %v345_v16, %v347_v18  ;;  %v356_v22 = vadd.f32 %v784_v15, %v348_v17 }
 0x15a   : > { %v357_v24 = vadd.f32 %v784_v15, %v349_v21  ;;  %v358_v25 = vmax.f32 %v356_v22, 0.0 }
 0x15c   : > { %v359_v26 = vmax.f32 %v357_v24, 0.0  ;;  %v364_v27 = vand.u32 4294967280, %v358_v25 }
 0x15e   : > { %v365_v28 = vand.u32 4294967280, %v359_v26  ;;  %v366_v29 = vor.u32 %v364_v27, %v1294_v23 }
 0x160   : > { %v367_v30 = vor.u32 %v365_v28, %v1294_v23  ;;  %v369_v31 = vsel %vm368_vm3, %v366_v29, 2147483647 }
 0x161   : > { %v371_v32 = vshra.s32 %v369_v31, 16  ;;  %v370_v37 = vand.u32 65535, %v369_v31 }
 0x162   : > { %v384_v33 = vsel %vm368_vm3, %v367_v30, 2147483647 }
 0x163   : > { %v373_v34 = vcvt.s32.f32 %v371_v32  ;;  %v386_v35 = vshra.s32 %v384_v33, 16  ;;  %v372_v39 = vcvt.s32.f32 %v370_v37  ;;  %v385_v40 = vand.u32 65535, %v384_v33 }
 0x165   : > { %374 = vmin.xlane.f32.xlu1 %v373_v34  ;;  %v388_v36 = vcvt.s32.f32 %v386_v35  ;;  %v387_v43 = vcvt.s32.f32 %v385_v40 }
 0x169   : > { %389 = vmin.xlane.f32.xlu1 %v388_v36 }
 0x1f2   : > { %v375_v38 = vpop.xlane.xlu1 %374 }
 0x1f3   : > { %vm376_vm4 = vcmp.eq.f32.partialorder %v373_v34, %v375_v38  ;;  %v381_v45 = vcvt.f32.s32 %v375_v38 }
 0x1f4   : > { %v377_v41 = vsel %vm376_vm4, %v372_v39, inf }
 0x1f5   : > { %378 = vmin.xlane.f32.xlu0 %v377_v41  ;;  %v382_v47 = vshll.u32 %v381_v45, 16 }
 0x1f6   : > { %v390_v42 = vpop.xlane.xlu1 %389 }
 0x1f7   : > { %vm391_vm5 = vcmp.eq.f32.partialorder %v388_v36, %v390_v42  ;;  %v396_v48 = vcvt.f32.s32 %v390_v42 }
 0x1f8   : > { %v392_v44 = vsel %vm391_vm5, %v387_v43, inf }
 0x1f9   : > { %393 = vmin.xlane.f32.xlu1 %v392_v44  ;;  %v397_v52 = vshll.u32 %v396_v48, 16 }
 0x282   : > { %v379_v46 = vpop.xlane.xlu0 %378 }
 0x283   : > { %v380_v49 = vcvt.f32.s32 %v379_v46 }
 0x285   : > { %v1300_v50 = vadd.s32 %v382_v47, %v380_v49 }
 0x286   : > { %v394_v51 = vpop.xlane.xlu1 %393 }
 0x287   : > { %vm404_vm6 = vcmp.eq.s32.totalorder %v366_v29, %v1300_v50  ;;  %v395_v53 = vcvt.f32.s32 %v394_v51  ;;  %v400_v39 = vand.u32 15, %v1300_v50 }
 0x288   : > { %v406_v54 = vsel %vm404_vm6, 2147483647, %v366_v29 }
 0x289   : > { %v1303_v55 = vadd.s32 %v397_v52, %v395_v53  ;;  %v408_v56 = vsel %vm368_vm3, %v406_v54, 2147483647  ;;  %v402_v45 = vsel %vm399_vm14, %v400_v39, 0 }
 0x28a   : > { %v410_v57 = vshra.s32 %v408_v56, 16  ;;  %v409_v63 = vand.u32 65535, %v408_v56 }
 0x28b   : > { %vm405_vm7 = vcmp.eq.s32.totalorder %v367_v30, %v1303_v55  ;;  %v401_v46 = vand.u32 15, %v1303_v55 }
 0x28c   : > { %v412_v58 = vcvt.s32.f32 %v410_v57  ;;  %v407_v59 = vsel %vm405_vm7, 2147483647, %v367_v30  ;;  %v411_v1 = vcvt.s32.f32 %v409_v63 }
 0x28d   : > { %v423_v60 = vsel %vm368_vm3, %v407_v59, 2147483647  ;;  %v403_v53 = vsel %vm399_vm14, %v401_v46, 0 }
 0x28e   : > { %413 = vmin.xlane.f32.xlu0 %v412_v58  ;;  %v425_v61 = vshra.s32 %v423_v60, 16  ;;  %v424_v2 = vand.u32 65535, %v423_v60 }
 0x290   : > { %v427_v62 = vcvt.s32.f32 %v425_v61  ;;  %v426_v5 = vcvt.s32.f32 %v424_v2 }
 0x292   : > { %428 = vmin.xlane.f32.xlu1 %v427_v62 }
 0x31b   : > { %v414_v0 = vpop.xlane.xlu0 %413 }
 0x31c   : > { %vm415_vm8 = vcmp.eq.f32.partialorder %v412_v58, %v414_v0  ;;  %v420_v7 = vcvt.f32.s32 %v414_v0 }
 0x31d   : > { %v416_v3 = vsel %vm415_vm8, %v411_v1, inf }
 0x31e   : > { %417 = vmin.xlane.f32.xlu0 %v416_v3  ;;  %v421_v9 = vshll.u32 %v420_v7, 16 }
 0x31f   : > { %v429_v4 = vpop.xlane.xlu1 %428 }
 0x320   : > { %vm430_vm9 = vcmp.eq.f32.partialorder %v427_v62, %v429_v4  ;;  %v435_v10 = vcvt.f32.s32 %v429_v4 }
 0x321   : > { %v431_v6 = vsel %vm430_vm9, %v426_v5, inf }
 0x322   : > { %432 = vmin.xlane.f32.xlu1 %v431_v6  ;;  %v436_v14 = vshll.u32 %v435_v10, 16 }
 0x3ab   : > { %v418_v8 = vpop.xlane.xlu0 %417 }
 0x3ac   : > { %v419_v11 = vcvt.f32.s32 %v418_v8 }
 0x3ae   : > { %v422_v12 = vadd.s32 %v421_v9, %v419_v11 }
 0x3af   : > { %v433_v13 = vpop.xlane.xlu1 %432 }
 0x3b0   : > { %vm438_vm10 = vcmp.eq.s32.totalorder %v406_v54, %v422_v12  ;;  %v434_v15 = vcvt.f32.s32 %v433_v13 }
 0x3b1   : > { %v440_v16 = vsel %vm438_vm10, 2147483647, %v406_v54  ;;  %vm545_vm10 = vcmp.eq.s32.totalorder %v1294_v23, 2 }
 0x3b2   : > { %v437_v17 = vadd.s32 %v436_v14, %v434_v15  ;;  %v442_v18 = vsel %vm368_vm3, %v440_v16, 2147483647 }
 0x3b3   : > { %v444_v19 = vshra.s32 %v442_v18, 16  ;;  %v443_v26 = vand.u32 65535, %v442_v18 }
 0x3b4   : > { %vm439_vm11 = vcmp.eq.s32.totalorder %v407_v59, %v437_v17 }
 0x3b5   : > { %v446_v20 = vcvt.s32.f32 %v444_v19  ;;  %v441_v21 = vsel %vm439_vm11, 2147483647, %v407_v59  ;;  %v445_v28 = vcvt.s32.f32 %v443_v26 }
 0x3b6   : > { %v457_v22 = vsel %vm368_vm3, %v441_v21, 2147483647 }
 0x3b7   : > { %447 = vmin.xlane.f32.xlu0 %v446_v20  ;;  %v459_v24 = vshra.s32 %v457_v22, 16  ;;  %v458_v29 = vand.u32 65535, %v457_v22 }
 0x3b9   : > { %v461_v25 = vcvt.s32.f32 %v459_v24  ;;  %v460_v32 = vcvt.s32.f32 %v458_v29 }
 0x3bb   : > { %462 = vmin.xlane.f32.xlu1 %v461_v25 }
 0x444   : > { %v448_v27 = vpop.xlane.xlu0 %447 }
 0x445   : > { %vm449_vm12 = vcmp.eq.f32.partialorder %v446_v20, %v448_v27  ;;  %v454_v34 = vcvt.f32.s32 %v448_v27 }
 0x446   : > { %v450_v30 = vsel %vm449_vm12, %v445_v28, inf }
 0x447   : > { %451 = vmin.xlane.f32.xlu0 %v450_v30  ;;  %v455_v36 = vshll.u32 %v454_v34, 16 }
 0x448   : > { %v463_v31 = vpop.xlane.xlu1 %462 }
 0x449   : > { %vm464_vm13 = vcmp.eq.f32.partialorder %v461_v25, %v463_v31  ;;  %v469_v37 = vcvt.f32.s32 %v463_v31 }
 0x44a   : > { %v465_v33 = vsel %vm464_vm13, %v460_v32, inf }
 0x44b   : > { %466 = vmin.xlane.f32.xlu1 %v465_v33  ;;  %v470_v42 = vshll.u32 %v469_v37, 16 }
 0x4d4   : > { %v452_v35 = vpop.xlane.xlu0 %451 }
 0x4d5   : > { %v453_v38 = vcvt.f32.s32 %v452_v35 }
 0x4d7   : > { %v456_v40 = vadd.s32 %v455_v36, %v453_v38 }
 0x4d8   : > { %v467_v41 = vpop.xlane.xlu1 %466 }
 0x4d9   : > { %v473_v43 = vand.u32 15, %v456_v40  ;;  %vm477_vm0 = vcmp.eq.s32.totalorder %v440_v16, %v456_v40  ;;  %v468_v44 = vcvt.f32.s32 %v467_v41 }
 0x4da   : > { %v479_v47 = vsel %vm477_vm0, 2147483647, %v440_v16 }
 0x4db   : > { %v1318_v48 = vsel %vm472_vm15, %v473_v43, %v402_v45  ;;  %v471_v49 = vadd.s32 %v470_v42, %v468_v44  ;;  %v481_v50 = vsel %vm368_vm3, %v479_v47, 2147483647 }
 0x4dc   : > { %v483_v51 = vshra.s32 %v481_v50, 16  ;;  %v482_v60 = vand.u32 65535, %v481_v50 }
 0x4dd   : > { %v474_v52 = vand.u32 15, %v471_v49  ;;  %vm478_vm1 = vcmp.eq.s32.totalorder %v441_v21, %v471_v49 }
 0x4de   : > { %v485_v54 = vcvt.s32.f32 %v483_v51  ;;  %v480_v56 = vsel %vm478_vm1, 2147483647, %v441_v21  ;;  %v484_v62 = vcvt.s32.f32 %v482_v60 }
 0x4df   : > { %v1325_v57 = vsel %vm472_vm15, %v474_v52, %v403_v53  ;;  %v496_v55 = vsel %vm368_vm3, %v480_v56, 2147483647 }
 0x4e0   : > { %486 = vmin.xlane.f32.xlu0 %v485_v54  ;;  %v498_v58 = vshra.s32 %v496_v55, 16  ;;  %v497_v63 = vand.u32 65535, %v496_v55 }
 0x4e2   : > { %v500_v59 = vcvt.s32.f32 %v498_v58  ;;  %v499_v2 = vcvt.s32.f32 %v497_v63 }
 0x4e4   : > { %501 = vmin.xlane.f32.xlu1 %v500_v59 }
 0x56d   : > { %v487_v61 = vpop.xlane.xlu0 %486 }
 0x56e   : > { %vm488_vm4 = vcmp.eq.f32.partialorder %v485_v54, %v487_v61  ;;  %v493_v4 = vcvt.f32.s32 %v487_v61 }
 0x56f   : > { %v489_v0 = vsel %vm488_vm4, %v484_v62, inf }
 0x570   : > { %490 = vmin.xlane.f32.xlu0 %v489_v0  ;;  %v494_v6 = vshll.u32 %v493_v4, 16 }
 0x571   : > { %v502_v1 = vpop.xlane.xlu1 %501 }
 0x572   : > { %vm503_vm5 = vcmp.eq.f32.partialorder %v500_v59, %v502_v1  ;;  %v508_v7 = vcvt.f32.s32 %v502_v1 }
 0x573   : > { %v504_v3 = vsel %vm503_vm5, %v499_v2, inf }
 0x574   : > { %505 = vmin.xlane.f32.xlu1 %v504_v3  ;;  %v509_v11 = vshll.u32 %v508_v7, 16 }
 0x5fd   : > { %v491_v5 = vpop.xlane.xlu0 %490 }
 0x5fe   : > { %v492_v8 = vcvt.f32.s32 %v491_v5 }
 0x600   : > { %v495_v9 = vadd.s32 %v494_v6, %v492_v8 }
 0x601   : > { %v506_v10 = vpop.xlane.xlu1 %505 }
 0x602   : > { %vm511_vm6 = vcmp.eq.s32.totalorder %v479_v47, %v495_v9  ;;  %v507_v12 = vcvt.f32.s32 %v506_v10 }
 0x603   : > { %v513_v13 = vsel %vm511_vm6, 2147483647, %v479_v47 }
 0x604   : > { %v510_v14 = vadd.s32 %v509_v11, %v507_v12  ;;  %v515_v15 = vsel %vm368_vm3, %v513_v13, 2147483647 }
 0x605   : > { %v517_v16 = vshra.s32 %v515_v15, 16  ;;  %v516_v22 = vand.u32 65535, %v515_v15 }
 0x606   : > { %vm512_vm7 = vcmp.eq.s32.totalorder %v480_v56, %v510_v14 }
 0x607   : > { %v519_v17 = vcvt.s32.f32 %v517_v16  ;;  %v514_v18 = vsel %vm512_vm7, 2147483647, %v480_v56  ;;  %v518_v25 = vcvt.s32.f32 %v516_v22 }
 0x608   : > { %v530_v19 = vsel %vm368_vm3, %v514_v18, 2147483647 }
 0x609   : > { %520 = vmin.xlane.f32.xlu0 %v519_v17  ;;  %v532_v20 = vshra.s32 %v530_v19, 16  ;;  %v531_v26 = vand.u32 65535, %v530_v19 }
 0x60b   : > { %v534_v21 = vcvt.s32.f32 %v532_v20  ;;  %v533_v29 = vcvt.s32.f32 %v531_v26 }
 0x60d   : > { %535 = vmin.xlane.f32.xlu1 %v534_v21 }
 0x696   : > { %v521_v24 = vpop.xlane.xlu0 %520 }
 0x697   : > { %vm522_vm8 = vcmp.eq.f32.partialorder %v519_v17, %v521_v24  ;;  %v527_v31 = vcvt.f32.s32 %v521_v24 }
 0x698   : > { %v523_v27 = vsel %vm522_vm8, %v518_v25, inf }
 0x699   : > { %524 = vmin.xlane.f32.xlu0 %v523_v27  ;;  %v528_v33 = vshll.u32 %v527_v31, 16 }
 0x69a   : > { %v536_v28 = vpop.xlane.xlu1 %535 }
 0x69b   : > { %vm537_vm9 = vcmp.eq.f32.partialorder %v534_v21, %v536_v28  ;;  %v542_v34 = vcvt.f32.s32 %v536_v28 }
 0x69c   : > { %v538_v30 = vsel %vm537_vm9, %v533_v29, inf }
 0x69d   : > { %539 = vmin.xlane.f32.xlu1 %v538_v30  ;;  %v543_v38 = vshll.u32 %v542_v34, 16 }
 0x726   : > { %v525_v32 = vpop.xlane.xlu0 %524 }
 0x727   : > { %v526_v35 = vcvt.f32.s32 %v525_v32 }
 0x729   : > { %v529_v36 = vadd.s32 %v528_v33, %v526_v35 }
 0x72a   : > { %v540_v37 = vpop.xlane.xlu1 %539 }
 0x72b   : > { %v546_v39 = vand.u32 15, %v529_v36  ;;  %vm550_vm11 = vcmp.eq.s32.totalorder %v513_v13, %v529_v36  ;;  %v541_v40 = vcvt.f32.s32 %v540_v37 }
 0x72c   : > { %v552_v41 = vsel %vm550_vm11, 2147483647, %v513_v13 }
 0x72d   : > { %v544_v42 = vadd.s32 %v543_v38, %v541_v40  ;;  %v554_v43 = vsel %vm368_vm3, %v552_v41, 2147483647  ;;  %v1333_v44 = vsel %vm545_vm10, %v546_v39, %v1318_v48 }
 0x72e   : > { %v556_v45 = vshra.s32 %v554_v43, 16  ;;  %v555_v54 = vand.u32 65535, %v554_v43 }
 0x72f   : > { %v547_v46 = vand.u32 15, %v544_v42  ;;  %vm551_vm12 = vcmp.eq.s32.totalorder %v514_v18, %v544_v42 }
 0x730   : > { %v558_v47 = vcvt.s32.f32 %v556_v45  ;;  %v553_v49 = vsel %vm551_vm12, 2147483647, %v514_v18  ;;  %v557_v55 = vcvt.s32.f32 %v555_v54 }
 0x731   : > { %v569_v50 = vsel %vm368_vm3, %v553_v49, 2147483647  ;;  %v1337_v51 = vsel %vm545_vm10, %v547_v46, %v1325_v57 }
 0x732   : > { %559 = vmin.xlane.f32.xlu0 %v558_v47  ;;  %v571_v52 = vshra.s32 %v569_v50, 16  ;;  %v570_v58 = vand.u32 65535, %v569_v50 }
 0x734   : > { %v573_v53 = vcvt.s32.f32 %v571_v52  ;;  %v572_v60 = vcvt.s32.f32 %v570_v58 }
 0x736   : > { %574 = vmin.xlane.f32.xlu1 %v573_v53 }
 0x7bf   : > { %v560_v56 = vpop.xlane.xlu0 %559 }
 0x7c0   : > { %vm561_vm13 = vcmp.eq.f32.partialorder %v558_v47, %v560_v56  ;;  %v566_v62 = vcvt.f32.s32 %v560_v56 }
 0x7c1   : > { %v562_v48 = vsel %vm561_vm13, %v557_v55, inf }
 0x7c2   : > { %563 = vmin.xlane.f32.xlu0 %v562_v48  ;;  %v567_v57 = vshll.u32 %v566_v62, 16 }
 0x7c3   : > { %v575_v59 = vpop.xlane.xlu1 %574 }
 0x7c4   : > { %vm576_vm14 = vcmp.eq.f32.partialorder %v573_v53, %v575_v59  ;;  %v581_v0 = vcvt.f32.s32 %v575_v59 }
 0x7c5   : > { %v577_v61 = vsel %vm576_vm14, %v572_v60, inf }
 0x7c6   : > { %578 = vmin.xlane.f32.xlu1 %v577_v61  ;;  %v582_v4 = vshll.u32 %v581_v0, 16 }
 0x84f   : > { %v564_v63 = vpop.xlane.xlu0 %563 }
 0x850   : > { %v565_v1 = vcvt.f32.s32 %v564_v63 }
 0x852   : > { %v568_v2 = vadd.s32 %v567_v57, %v565_v1 }
 0x853   : > { %v579_v3 = vpop.xlane.xlu1 %578 }
 0x854   : > { %vm584_vm15 = vcmp.eq.s32.totalorder %v552_v41, %v568_v2  ;;  %v580_v5 = vcvt.f32.s32 %v579_v3 }
 0x855   : > { %v586_v6 = vsel %vm584_vm15, 2147483647, %v552_v41 }
 0x856   : > { %v583_v7 = vadd.s32 %v582_v4, %v580_v5  ;;  %v588_v8 = vsel %vm368_vm3, %v586_v6, 2147483647 }
 0x857   : > { %v590_v9 = vshra.s32 %v588_v8, 16  ;;  %v589_v15 = vand.u32 65535, %v588_v8 }
 0x858   : > { %vm585_vm0 = vcmp.eq.s32.totalorder %v553_v49, %v583_v7 }
 0x859   : > { %v592_v10 = vcvt.s32.f32 %v590_v9  ;;  %v587_v11 = vsel %vm585_vm0, 2147483647, %v553_v49  ;;  %v591_v17 = vcvt.s32.f32 %v589_v15 }
 0x85a   : > { %v603_v12 = vsel %vm368_vm3, %v587_v11, 2147483647  ;;  %vm618_vm3 = vcmp.eq.s32.totalorder %v1294_v23, 3 }
 0x85b   : > { %593 = vmin.xlane.f32.xlu0 %v592_v10  ;;  %v605_v13 = vshra.s32 %v603_v12, 16  ;;  %v604_v18 = vand.u32 65535, %v603_v12 }
 0x85d   : > { %v607_v14 = vcvt.s32.f32 %v605_v13  ;;  %v606_v21 = vcvt.s32.f32 %v604_v18 }
 0x85f   : > { %608 = vmin.xlane.f32.xlu1 %v607_v14 }
 0x8e8   : > { %v594_v16 = vpop.xlane.xlu0 %593 }
 0x8e9   : > { %vm595_vm1 = vcmp.eq.f32.partialorder %v592_v10, %v594_v16  ;;  %v600_v24 = vcvt.f32.s32 %v594_v16 }
 0x8ea   : > { %v596_v19 = vsel %vm595_vm1, %v591_v17, inf }
 0x8eb   : > { %597 = vmin.xlane.f32.xlu0 %v596_v19  ;;  %v601_v26 = vshll.u32 %v600_v24, 16 }
 0x8ec   : > { %v609_v20 = vpop.xlane.xlu1 %608 }
 0x8ed   : > { %vm610_vm4 = vcmp.eq.f32.partialorder %v607_v14, %v609_v20  ;;  %v615_v27 = vcvt.f32.s32 %v609_v20 }
 0x8ee   : > { %v611_v22 = vsel %vm610_vm4, %v606_v21, inf }
 0x8ef   : > { %612 = vmin.xlane.f32.xlu1 %v611_v22  ;;  %v616_v31 = vshll.u32 %v615_v27, 16 }
 0x978   : > { %v598_v25 = vpop.xlane.xlu0 %597 }
 0x979   : > { %v599_v28 = vcvt.f32.s32 %v598_v25 }
 0x97b   : > { %v602_v29 = vadd.s32 %v601_v26, %v599_v28 }
 0x97c   : > { %v613_v30 = vpop.xlane.xlu1 %612 }
 0x97d   : > { %v619_v32 = vand.u32 15, %v602_v29  ;;  %v614_v33 = vcvt.f32.s32 %v613_v30 }
 0x97f   : > { %v621_v34 = vsel %vm618_vm3, %v619_v32, %v1333_v44  ;;  %v617_v35 = vadd.s32 %v616_v31, %v614_v33 }
 0x980   : > { %623 = vst.msk [vmem:[%s274_s22] sm:$0xff] %vm287_vm2, %v621_v34 }
 0x981   : > { %v620_v36 = vand.u32 15, %v617_v35 }
 0x983   : > { %v622_v23 = vsel %vm618_vm3, %v620_v36, %v1337_v51 }
 0x984   : > { %624 = vst.msk [vmem:[%s274_s22 + $0x8] sm:$0xff] %vm287_vm2, %v622_v23 }
 0x985   : > { %983 = shalt.err (!%p980_p13)
}
 0x986   : > { %s984_s21 = scalar_lea.hbm %s1349_s10, 256  ;;  %s988_s4 = scalar_lea.hbm %s1405_s3, 512 }
 0x987   : > { %p985_p2 = scmp.ne.s32.totalorder %s1349_s10, %s984_s21  ;;  %p989_p7 = scmp.lt.u32.totalorder %s1349_s10, %s1405_s3 }
 0x988   : > { %p990_p3 = scmp.lt.u32.totalorder %s988_s4, %s984_s21  ;;  %p992_p0 = scmp.lt.u32.totalorder %s984_s21, %s1349_s10 }
 0x989   : > { %p986_p11 = pnand %p985_p2, %p1427_p10 }
 0x98a   : > { %p991_p4 = por %p990_p3, %p989_p7 }
 0x98b   : > { %p987_p5 = pneg %p986_p11 }
 0x98c   : > { %p993_p12 = por %p992_p0, %p991_p4 }
 0x98e   : > { %p994_p1 = pnand %p993_p12, %p987_p5 }
 0x990   : > { %997 = shalt.err (!%p994_p1)
}
 0x991   : > { %s1066_s23 = smov 128   ;;  %s1067_s18 = smov 8  }
 0x992   : > { %806 = dma.vmem_to_hbm [thread:$0]  (%p1427_p10), %s1351_s29, 256, %s1349_s10, %s626_s15, %s1066_s23, %s1066_s23, %s1067_s18  }
 0x993 PF: > { %s656_s24 = sand.u32 1, %s1036_s12   ;;  %p1428_p8 = scmp.ne.s32.totalorder %s1416_s27, 0 }
 0x994   : > { %p1429_p9 = scmp.ge.s32.totalorder %s1056_s17, 2  ;;  %s657_s7 = scalar_lea.sflag [#allocation4], %s656_s24 }
 0x996   : > { %p819_p6 = pnand %p1429_p9, %p1428_p8 }
 0x998   : > { %1031 = dma.done.wait (!%p819_p6), %s657_s7, 256  }
 0x999   : > { %1033 = vsyncadd (!%p819_p6), %s657_s7, 4294967040  ;;  %s22_s17 = sadd.s32 1, %s1056_s17   ;;  %s1430_s25 = sld [smem:[#allocation12_spill]] }
 0x99a   : > { %p19_p13 = scmp.ge.s32.totalorder %s22_s17, 4   ;;  %s1431_s12 = smov %s1040_s13 }
 0x99b   : > { %s1432_s13 = smov %s1044_s14  ;;  %s1433_s14 = smov %s1148_s26 }
 0x99c   : > { %s1434_s15 = smov %s1052_s16  ;;  %21 = sbr.rel (!%p19_p13) target bundleno = 11 (0xb), region = 101 }
 0x99f   : > { %s1435_s16 = smov %s1430_s25 }
 0x9a3   :  { %662 = vsyncpa [#allocation3], 1 }
 0x9a4   :  { %664 = vsyncpa [#allocation3 + $0x1], 1 }
 0x9a5   :  { %665 = vsyncpa [#allocation6], 1 }
 0x9a6   :  { %667 = vsyncpa [#allocation6 + $0x1], 1 }
 0x9a7   :  { %668 = vsyncpa [#allocation4], 1 }
 0x9a8   :  { %670 = vsyncpa [#allocation4 + $0x1], 1 }

</bundles_post_ra>
